<compile_context>
chip_gen: v7x
topology: tpu7x:2x2x1
jax: 0.10.0
libtpu: 0.0.40
codegen_flags: <defaults>
</compile_context>

<pallas_src>
import functools

import jax
import jax.numpy as jnp
from jax import lax
from jax.experimental import pallas as pl
from jax.experimental.pallas import tpu as pltpu


def _shuffle_residual_kernel(x_ref, wdw_ref, wm_ref, wr_ref, mask_ref, b_ref,
                             o_ref, *, W):
    # x_ref   : (B*Cin, HW)   bf16 — one row == one (image, channel) spatial plane
    # wdw_ref : (B*Cin, 9)    bf16 depthwise taps (shuffle-permuted, * BN1 scale)
    # wm_ref  : (B*C2, B*C1)  bf16 batch-block-diag gconv2 (* BN2 scale) weight
    # wr_ref  : (B*C2, B*Cin) bf16 batch-block-diag residual 1x1 weight
    # mask_ref: (4, HW)       f32 {not_left, not_right, not_top, not_bottom}
    # b_ref   : (B*C2, 1)     f32 combined bias
    # o_ref   : (B*C2, HW)    f32
    x_bf = x_ref[...]
    x = x_bf.astype(jnp.float32)                      # f32 tap math (v5e-safe)
    HW = x.shape[1]

    not_l = mask_ref[0:1, :]
    not_r = mask_ref[1:2, :]
    not_t = mask_ref[2:3, :]
    not_b = mask_ref[3:4, :]

    def shift(a, d):
        # out[:, p] = a[:, (p + d) % HW]  (circular per row; wrapped lanes are
        # exactly the ones the boundary masks zero out).
        s = (-d) % HW
        return pltpu.roll(a, shift=s, axis=1) if s else a

    # Column taps first; their masks commute with the row shifts below because a
    # shift by a multiple of W never changes the column index.
    xc = (shift(x, -1) * not_l, x, shift(x, 1) * not_r)

    wdw = wdw_ref[...].astype(jnp.float32)            # hoisted once, (B*Cin, 9)
    acc = jnp.zeros_like(x)
    for kh in range(3):
        row = jnp.zeros_like(x)
        for kw in range(3):
            k = kh * 3 + kw
            src = xc[kw] if kh == 1 else shift(xc[kw], (kh - 1) * W)
            row = row + src * wdw[:, k:k + 1]
        if kh == 0:
            row = row * not_t
        elif kh == 2:
            row = row * not_b
        acc = acc + row

    # Fused (batch-block-diagonal) 1x1 convs: one MXU weight push per dot covers
    # every image in the block; x feeds the residual dot straight from its VMEM
    # input block (no concat / copy).
    y = jnp.dot(wm_ref[...], acc.astype(jnp.bfloat16),
                preferred_element_type=jnp.float32)
    y = y + jnp.dot(wr_ref[...], x_bf, preferred_element_type=jnp.float32)
    y = y + b_ref[...]                                # minor broadcast add
    o_ref[...] = jnp.maximum(y, 0.0)


def _fold_params(params, groups):
    """Fold channel_shuffle + both BatchNorms + all biases into the weights."""
    wdw, s1, b1, w2, s2, b2, wres, bres = params
    C1 = wdw.shape[-1]
    Cin, C2 = wres.shape
    cpg = C1 // groups
    # channel_shuffle permutation: xs[:, c] = x[:, src[c]]
    src = jnp.arange(C1).reshape(groups, cpg).T.reshape(-1)
    inv = jnp.argsort(src)
    wdw_s = wdw * s1                                   # (3,3,C1), BN1 scale
    w2_s = w2 * s2                                     # (C1,C2), BN2 scale
    # Fold the shuffle into the per-channel taps and the rows of w2 (depthwise
    # conv is per-channel, so the data shuffle commutes into a weight permute).
    wdw_k = jnp.transpose(wdw_s[:, :, inv], (2, 0, 1)).reshape(C1, 9)
    w_main = w2_s[inv, :].T                            # (C2, C1)
    w_res = wres.T                                     # (C2, Cin)
    bias = (b1 @ w2_s + b2 + bres).reshape(C2, 1)      # combined bias
    return wdw_k, w_main, w_res, bias


def _pick_batch_block(N, Cin, C2, HW):
    """Images per grid step: big blocks (HBM-bound), but sized for v7x VMEM and
    keeping >= 2 parallel grid steps so v7x's two TensorCores both get work."""
    x_img = Cin * HW * 2                 # bf16 input block (per image)
    out_img = C2 * HW * 4                # f32 output block (per image)
    tmp_img = 8 * Cin * HW * 4           # f32 in-kernel temporaries (rolls/acc)
    per_img = 2 * (x_img + out_img) + tmp_img          # 2x: double buffering
    budget = 20 * 1024 * 1024            # headroom under v7x's 64 MiB physical
    b = int(max(1, min(budget // per_img, 64, N // 2 if N >= 2 else 1)))

    def _ok(bb):   # divides N and keeps block sublane dims 8-aligned
        return N % bb == 0 and (bb * Cin) % 8 == 0 and (bb * C2) % 8 == 0

    while b > 1 and not _ok(b):
        b -= 1
    if not _ok(b):
        b = N     # single full-array block is always a legal BlockSpec
    return b


def shuffle_residual_block_pallas(x_nchw, params, groups):
    """x_nchw: (N, Cin, H, W) float32.  Returns NCHW output (N, C2, H, W) f32."""
    N, Cin, H, W = x_nchw.shape
    HW = H * W
    wdw_k, w_main, w_res, bias = _fold_params(params, groups)
    C1 = wdw_k.shape[0]
    C2 = w_main.shape[0]
    assert Cin == C1, "module forward requires in_c == out_c1"

    B = _pick_batch_block(N, Cin, C2, HW)
    R_in, R_out = B * Cin, B * C2

    # Flat (image*channel, spatial) layout: free reshape of NCHW, lane-dense HW.
    x2d = x_nchw.reshape(N * Cin, HW).astype(jnp.bfloat16)

    # Per-block constants (constant index_map -> DMA'd once, stay VMEM-resident).
    wdw_t = jnp.tile(wdw_k, (B, 1)).astype(jnp.bfloat16)            # (R_in, 9)
    eye_b = jnp.eye(B, dtype=jnp.float32)
    wm_bd = jnp.kron(eye_b, w_main).astype(jnp.bfloat16)            # (R_out, R_in)
    wr_bd = jnp.kron(eye_b, w_res).astype(jnp.bfloat16)             # (R_out, R_in)
    bias_t = jnp.tile(bias, (B, 1))                                 # (R_out, 1)

    # Boundary masks, hoisted out of the kernel (no per-step iota / % / compares).
    p = jnp.arange(HW, dtype=jnp.int32)
    col = p % W
    masks = jnp.stack([col > 0, col < W - 1, p >= W, p < HW - W]
                      ).astype(jnp.float32)                          # (4, HW)

    kernel = functools.partial(_shuffle_residual_kernel, W=W)
    out = pl.pallas_call(
        kernel,
        out_shape=jax.ShapeDtypeStruct((N * C2, HW), jnp.float32),
        grid=(N // B,),
        in_specs=[
            pl.BlockSpec((R_in, HW), lambda i: (i, 0)),
            pl.BlockSpec((R_in, 9), lambda i: (0, 0)),
            pl.BlockSpec((R_out, R_in), lambda i: (0, 0)),
            pl.BlockSpec((R_out, R_in), lambda i: (0, 0)),
            pl.BlockSpec((4, HW), lambda i: (0, 0)),
            pl.BlockSpec((R_out, 1), lambda i: (0, 0)),
        ],
        out_specs=pl.BlockSpec((R_out, HW), lambda i: (i, 0)),
        compiler_params=pltpu.CompilerParams(
            dimension_semantics=("parallel",),
            vmem_limit_bytes=48 * 1024 * 1024),
    )(x2d, wdw_t, wm_bd, wr_bd, masks, bias_t)
    return out.reshape(N, C2, H, W)                    # NCHW, like PyTorch


if __name__ == "__main__":
    # Shapes: the module's forward requires in_c == out_c1 (channel_shuffle(x)
    # feeds dwconv) and uses a real residual conv because in_c != out_c2.
    # N=4 exercises batched blocks (B_blk=2) while keeping 2 parallel grid steps.
    N, in_c, H, W = 4, 8, 16, 16
    out_c1, out_c2, groups = 8, 16, 4
    eps = 1e-5

    keys = jax.random.split(jax.random.PRNGKey(0), 12)
    x = jax.random.normal(keys[0], (N, in_c, H, W), jnp.float32)

    # depthwise 3x3 weight (PyTorch shape (C1,1,3,3)) stored as (3,3,C1)
    wdw = 0.2 * jax.random.normal(keys[1], (3, 3, out_c1), jnp.float32)
    # BN after dwconv (eval mode) -> per-channel scale / bias
    g1 = 1.0 + 0.1 * jax.random.normal(keys[2], (out_c1,), jnp.float32)
    be1 = 0.1 * jax.random.normal(keys[3], (out_c1,), jnp.float32)
    rm1 = 0.1 * jax.random.normal(keys[4], (out_c1,), jnp.float32)
    rv1 = jax.random.uniform(keys[5], (out_c1,), minval=0.5, maxval=1.5)
    s1 = g1 / jnp.sqrt(rv1 + eps)
    b1 = be1 - rm1 * s1

    # grouped 1x1 conv (PyTorch weight (C2, C1//g, 1, 1)) as block-diag (C1, C2)
    cpg_in, cpg_out = out_c1 // groups, out_c2 // groups
    w2_g = 0.2 * jax.random.normal(keys[6], (groups, cpg_in, cpg_out), jnp.float32)
    w2 = jax.scipy.linalg.block_diag(*[w2_g[i] for i in range(groups)])

    g2 = 1.0 + 0.1 * jax.random.normal(keys[7], (out_c2,), jnp.float32)
    be2 = 0.1 * jax.random.normal(keys[8], (out_c2,), jnp.float32)
    rm2 = 0.1 * jax.random.normal(keys[9], (out_c2,), jnp.float32)
    rv2 = jax.random.uniform(keys[10], (out_c2,), minval=0.5, maxval=1.5)
    s2 = g2 / jnp.sqrt(rv2 + eps)
    b2 = be2 - rm2 * s2

    # residual 1x1 conv (in_c != out_c2 -> real conv with bias), stored (Cin, C2)
    wres = 0.2 * jax.random.normal(keys[11], (in_c, out_c2), jnp.float32)
    bres = 0.05 * jnp.arange(out_c2, dtype=jnp.float32)

    params = (wdw, s1, b1, w2, s2, b2, wres, bres)

    fwd = jax.jit(lambda xin: shuffle_residual_block_pallas(xin, params, groups))
    out = jax.block_until_ready(fwd(x))

    # ---- pure-JAX reference (same math, lax.conv / einsum), NCHW output ----
    def reference(xr):
        xs = xr.reshape(N, groups, in_c // groups, H, W)
        xs = jnp.transpose(xs, (0, 2, 1, 3, 4)).reshape(N, in_c, H, W)
        xs = jnp.transpose(xs, (0, 2, 3, 1))                        # NHWC
        dw = lax.conv_general_dilated(
            xs, wdw.reshape(3, 3, 1, out_c1), (1, 1), 'SAME',
            feature_group_count=out_c1,
            dimension_numbers=('NHWC', 'HWIO', 'NHWC'))
        dw = dw * s1 + b1
        y = jnp.einsum('nhwc,cd->nhwd', dw, w2) * s2 + b2
        r = jnp.einsum('nhwc,cd->nhwd', jnp.transpose(xr, (0, 2, 3, 1)), wres) + bres
        return jnp.transpose(jnp.maximum(y + r, 0.0), (0, 3, 1, 2))  # NCHW

    # The kernel stores activations/weights in bf16 for HBM I/O; compare against
    # an f32 reference fed the same bf16-rounded activations, with bf16-level
    # tolerances.
    x_q = x.astype(jnp.bfloat16).astype(jnp.float32)
    ref = reference(x_q)
    err = float(jnp.max(jnp.abs(out - ref)))
    assert out.shape == ref.shape == (N, out_c2, H, W)
    assert jnp.allclose(out, ref, atol=5e-2, rtol=5e-2), f"max abs err {err}"
    print("KERNEL_OK")
</pallas_src>

<mosaic_0001>
module attributes {stable_mosaic.version = 11 : i64} {
  func.func @_shuffle_residual_kernel(%arg0: i32, %arg1: memref<16x256xbf16, #tpu.memory_space<vmem>>, %arg2: memref<16x9xbf16, #tpu.memory_space<vmem>>, %arg3: memref<32x16xbf16, #tpu.memory_space<vmem>>, %arg4: memref<32x16xbf16, #tpu.memory_space<vmem>>, %arg5: memref<4x256xf32, #tpu.memory_space<vmem>>, %arg6: memref<32x1xf32, #tpu.memory_space<vmem>>, %arg7: memref<32x256xf32, #tpu.memory_space<vmem>>) attributes {dimension_semantics = [#tpu.dimension_semantics<parallel>], iteration_bounds = array<i64: 2>, scalar_prefetch = 0 : i64, scratch_operands = 0 : i64, tpu.core_type = #tpu.core_type<tc>, window_params = [{transform_indices = @transform_0, window_bounds = array<i64: 16, 256>}, {pipeline_mode = #tpu.pipeline_mode<synchronous>, transform_indices = @transform_1, window_bounds = array<i64: 16, 9>}, {pipeline_mode = #tpu.pipeline_mode<synchronous>, transform_indices = @transform_2, window_bounds = array<i64: 32, 16>}, {pipeline_mode = #tpu.pipeline_mode<synchronous>, transform_indices = @transform_3, window_bounds = array<i64: 32, 16>}, {pipeline_mode = #tpu.pipeline_mode<synchronous>, transform_indices = @transform_4, window_bounds = array<i64: 4, 256>}, {pipeline_mode = #tpu.pipeline_mode<synchronous>, transform_indices = @transform_5, window_bounds = array<i64: 32, 1>}, {transform_indices = @transform_6, window_bounds = array<i64: 32, 256>}]} {
    %c0 = arith.constant 0 : index
    %c0_0 = arith.constant 0 : index
    %0 = vector.load %arg1[%c0, %c0_0] : memref<16x256xbf16, #tpu.memory_space<vmem>>, vector<16x256xbf16>
    %1 = arith.extf %0 : vector<16x256xbf16> to vector<16x256xf32>
    %c0_1 = arith.constant 0 : index
    %c0_2 = arith.constant 0 : index
    %2 = vector.load %arg5[%c0_1, %c0_2] : memref<4x256xf32, #tpu.memory_space<vmem>>, vector<1x256xf32>
    %c1 = arith.constant 1 : index
    %c0_3 = arith.constant 0 : index
    %3 = vector.load %arg5[%c1, %c0_3] : memref<4x256xf32, #tpu.memory_space<vmem>>, vector<1x256xf32>
    %c2 = arith.constant 2 : index
    %c0_4 = arith.constant 0 : index
    %4 = vector.load %arg5[%c2, %c0_4] : memref<4x256xf32, #tpu.memory_space<vmem>>, vector<1x256xf32>
    %c3 = arith.constant 3 : index
    %c0_5 = arith.constant 0 : index
    %5 = vector.load %arg5[%c3, %c0_5] : memref<4x256xf32, #tpu.memory_space<vmem>>, vector<1x256xf32>
    %c1_i32 = arith.constant 1 : i32
    %6 = tpu.dynamic_rotate %1 by %c1_i32 dim 1 : vector<16x256xf32>, i32 -> vector<16x256xf32>
    %7 = vector.broadcast %2 : vector<1x256xf32> to vector<16x256xf32>
    %8 = arith.mulf %6, %7 : vector<16x256xf32>
    %c255_i32 = arith.constant 255 : i32
    %9 = tpu.dynamic_rotate %1 by %c255_i32 dim 1 : vector<16x256xf32>, i32 -> vector<16x256xf32>
    %10 = vector.broadcast %3 : vector<1x256xf32> to vector<16x256xf32>
    %11 = arith.mulf %9, %10 : vector<16x256xf32>
    %c0_6 = arith.constant 0 : index
    %c0_7 = arith.constant 0 : index
    %12 = vector.load %arg2[%c0_6, %c0_7] : memref<16x9xbf16, #tpu.memory_space<vmem>>, vector<16x9xbf16>
    %13 = arith.extf %12 : vector<16x9xbf16> to vector<16x9xf32>
    %cst = arith.constant 0.000000e+00 : f32
    %14 = vector.broadcast %cst : f32 to vector<16x256xf32>
    %cst_8 = arith.constant 0.000000e+00 : f32
    %15 = vector.broadcast %cst_8 : f32 to vector<16x256xf32>
    %c16_i32 = arith.constant 16 : i32
    %16 = tpu.dynamic_rotate %8 by %c16_i32 dim 1 : vector<16x256xf32>, i32 -> vector<16x256xf32>
    %17 = vector.extract_strided_slice %13 {offsets = [0, 0], sizes = [16, 1], strides = [1, 1]} : vector<16x9xf32> to vector<16x1xf32>
    %18 = vector.broadcast %17 : vector<16x1xf32> to vector<16x256xf32>
    %19 = arith.mulf %16, %18 : vector<16x256xf32>
    %20 = arith.addf %15, %19 : vector<16x256xf32>
    %c16_i32_9 = arith.constant 16 : i32
    %21 = tpu.dynamic_rotate %1 by %c16_i32_9 dim 1 : vector<16x256xf32>, i32 -> vector<16x256xf32>
    %22 = vector.extract_strided_slice %13 {offsets = [0, 1], sizes = [16, 1], strides = [1, 1]} : vector<16x9xf32> to vector<16x1xf32>
    %23 = vector.broadcast %22 : vector<16x1xf32> to vector<16x256xf32>
    %24 = arith.mulf %21, %23 : vector<16x256xf32>
    %25 = arith.addf %20, %24 : vector<16x256xf32>
    %c16_i32_10 = arith.constant 16 : i32
    %26 = tpu.dynamic_rotate %11 by %c16_i32_10 dim 1 : vector<16x256xf32>, i32 -> vector<16x256xf32>
    %27 = vector.extract_strided_slice %13 {offsets = [0, 2], sizes = [16, 1], strides = [1, 1]} : vector<16x9xf32> to vector<16x1xf32>
    %28 = vector.broadcast %27 : vector<16x1xf32> to vector<16x256xf32>
    %29 = arith.mulf %26, %28 : vector<16x256xf32>
    %30 = arith.addf %25, %29 : vector<16x256xf32>
    %31 = vector.broadcast %4 : vector<1x256xf32> to vector<16x256xf32>
    %32 = arith.mulf %30, %31 : vector<16x256xf32>
    %33 = arith.addf %14, %32 : vector<16x256xf32>
    %cst_11 = arith.constant 0.000000e+00 : f32
    %34 = vector.broadcast %cst_11 : f32 to vector<16x256xf32>
    %35 = vector.extract_strided_slice %13 {offsets = [0, 3], sizes = [16, 1], strides = [1, 1]} : vector<16x9xf32> to vector<16x1xf32>
    %36 = vector.broadcast %35 : vector<16x1xf32> to vector<16x256xf32>
    %37 = arith.mulf %8, %36 : vector<16x256xf32>
    %38 = arith.addf %34, %37 : vector<16x256xf32>
    %39 = vector.extract_strided_slice %13 {offsets = [0, 4], sizes = [16, 1], strides = [1, 1]} : vector<16x9xf32> to vector<16x1xf32>
    %40 = vector.broadcast %39 : vector<16x1xf32> to vector<16x256xf32>
    %41 = arith.mulf %1, %40 : vector<16x256xf32>
    %42 = arith.addf %38, %41 : vector<16x256xf32>
    %43 = vector.extract_strided_slice %13 {offsets = [0, 5], sizes = [16, 1], strides = [1, 1]} : vector<16x9xf32> to vector<16x1xf32>
    %44 = vector.broadcast %43 : vector<16x1xf32> to vector<16x256xf32>
    %45 = arith.mulf %11, %44 : vector<16x256xf32>
    %46 = arith.addf %42, %45 : vector<16x256xf32>
    %47 = arith.addf %33, %46 : vector<16x256xf32>
    %cst_12 = arith.constant 0.000000e+00 : f32
    %48 = vector.broadcast %cst_12 : f32 to vector<16x256xf32>
    %c240_i32 = arith.constant 240 : i32
    %49 = tpu.dynamic_rotate %8 by %c240_i32 dim 1 : vector<16x256xf32>, i32 -> vector<16x256xf32>
    %50 = vector.extract_strided_slice %13 {offsets = [0, 6], sizes = [16, 1], strides = [1, 1]} : vector<16x9xf32> to vector<16x1xf32>
    %51 = vector.broadcast %50 : vector<16x1xf32> to vector<16x256xf32>
    %52 = arith.mulf %49, %51 : vector<16x256xf32>
    %53 = arith.addf %48, %52 : vector<16x256xf32>
    %c240_i32_13 = arith.constant 240 : i32
    %54 = tpu.dynamic_rotate %1 by %c240_i32_13 dim 1 : vector<16x256xf32>, i32 -> vector<16x256xf32>
    %55 = vector.extract_strided_slice %13 {offsets = [0, 7], sizes = [16, 1], strides = [1, 1]} : vector<16x9xf32> to vector<16x1xf32>
    %56 = vector.broadcast %55 : vector<16x1xf32> to vector<16x256xf32>
    %57 = arith.mulf %54, %56 : vector<16x256xf32>
    %58 = arith.addf %53, %57 : vector<16x256xf32>
    %c240_i32_14 = arith.constant 240 : i32
    %59 = tpu.dynamic_rotate %11 by %c240_i32_14 dim 1 : vector<16x256xf32>, i32 -> vector<16x256xf32>
    %60 = vector.extract_strided_slice %13 {offsets = [0, 8], sizes = [16, 1], strides = [1, 1]} : vector<16x9xf32> to vector<16x1xf32>
    %61 = vector.broadcast %60 : vector<16x1xf32> to vector<16x256xf32>
    %62 = arith.mulf %59, %61 : vector<16x256xf32>
    %63 = arith.addf %58, %62 : vector<16x256xf32>
    %64 = vector.broadcast %5 : vector<1x256xf32> to vector<16x256xf32>
    %65 = arith.mulf %63, %64 : vector<16x256xf32>
    %66 = arith.addf %47, %65 : vector<16x256xf32>
    %c0_15 = arith.constant 0 : index
    %c0_16 = arith.constant 0 : index
    %67 = vector.load %arg3[%c0_15, %c0_16] : memref<32x16xbf16, #tpu.memory_space<vmem>>, vector<32x16xbf16>
    %68 = arith.truncf %66 : vector<16x256xf32> to vector<16x256xbf16>
    %cst_17 = arith.constant dense<0.000000e+00> : vector<32x256xf32>
    %69 = tpu.matmul %67, %68, %cst_17 {dimension_numbers = #tpu.dot_dimension_numbers<[1], [0], [0], [1], [0, 0, 1, 1], [], []>} : vector<32x16xbf16>, vector<16x256xbf16>, vector<32x256xf32> -> vector<32x256xf32>
    %c0_18 = arith.constant 0 : index
    %c0_19 = arith.constant 0 : index
    %70 = vector.load %arg4[%c0_18, %c0_19] : memref<32x16xbf16, #tpu.memory_space<vmem>>, vector<32x16xbf16>
    %cst_20 = arith.constant dense<0.000000e+00> : vector<32x256xf32>
    %71 = tpu.matmul %70, %0, %cst_20 {dimension_numbers = #tpu.dot_dimension_numbers<[1], [0], [0], [1], [0, 0, 1, 1], [], []>} : vector<32x16xbf16>, vector<16x256xbf16>, vector<32x256xf32> -> vector<32x256xf32>
    %72 = arith.addf %69, %71 : vector<32x256xf32>
    %c0_21 = arith.constant 0 : index
    %c0_22 = arith.constant 0 : index
    %73 = vector.load %arg6[%c0_21, %c0_22] : memref<32x1xf32, #tpu.memory_space<vmem>>, vector<32x1xf32>
    %74 = vector.broadcast %73 : vector<32x1xf32> to vector<32x256xf32>
    %75 = arith.addf %72, %74 : vector<32x256xf32>
    %cst_23 = arith.constant 0.000000e+00 : f32
    %76 = vector.broadcast %cst_23 : f32 to vector<32x256xf32>
    %77 = arith.maximumf %75, %76 : vector<32x256xf32>
    %c0_24 = arith.constant 0 : index
    %c0_25 = arith.constant 0 : index
    %78 = vector.load %arg7[%c0_24, %c0_25] : memref<32x256xf32, #tpu.memory_space<vmem>>, vector<32x256xf32>
    tpu.vector_store %arg7[%c0_24, %c0_25], %77 {strides = array<i32>} : memref<32x256xf32, #tpu.memory_space<vmem>>, vector<32x256xf32>,
    return
  }
  func.func @transform_0(%arg0: i32) -> (i32, i32) {
    %c0_i32 = arith.constant 0 : i32
    %c0_i32_0 = arith.constant 0 : i32
    return %arg0, %c0_i32 : i32, i32
  }
  func.func @transform_1(%arg0: i32) -> (i32, i32) {
    %c0_i32 = arith.constant 0 : i32
    %c0_i32_0 = arith.constant 0 : i32
    %c0_i32_1 = arith.constant 0 : i32
    return %c0_i32, %c0_i32_0 : i32, i32
  }
  func.func @transform_2(%arg0: i32) -> (i32, i32) {
    %c0_i32 = arith.constant 0 : i32
    %c0_i32_0 = arith.constant 0 : i32
    %c0_i32_1 = arith.constant 0 : i32
    return %c0_i32, %c0_i32_0 : i32, i32
  }
  func.func @transform_3(%arg0: i32) -> (i32, i32) {
    %c0_i32 = arith.constant 0 : i32
    %c0_i32_0 = arith.constant 0 : i32
    %c0_i32_1 = arith.constant 0 : i32
    return %c0_i32, %c0_i32_0 : i32, i32
  }
  func.func @transform_4(%arg0: i32) -> (i32, i32) {
    %c0_i32 = arith.constant 0 : i32
    %c0_i32_0 = arith.constant 0 : i32
    %c0_i32_1 = arith.constant 0 : i32
    return %c0_i32, %c0_i32_0 : i32, i32
  }
  func.func @transform_5(%arg0: i32) -> (i32, i32) {
    %c0_i32 = arith.constant 0 : i32
    %c0_i32_0 = arith.constant 0 : i32
    %c0_i32_1 = arith.constant 0 : i32
    return %c0_i32, %c0_i32_0 : i32, i32
  }
  func.func @transform_6(%arg0: i32) -> (i32, i32) {
    %c0_i32 = arith.constant 0 : i32
    %c0_i32_0 = arith.constant 0 : i32
    return %arg0, %c0_i32 : i32, i32
  }
}

</mosaic_0001>

<bundles_post_ra>
// kernel: _lambda_.1
= control target key start
LH: loop header
LB: loop body
LE: loop exit
PB: predicated region body
PF: predicated region fallthrough
CT: control target
= control target key end

     0   :  { %s1081_s21 = smov 0   ;;  %s1323_s0 = inlined_call_operand.vmem [shape: bf16[32,256], index: 0, kind: input, shape index: {}]   ;;  %s1324_s1 = inlined_call_operand.vmem [shape: bf16[16,9], index: 1, kind: input, shape index: {}]   ;;  %s1325_s2 = inlined_call_operand.vmem [shape: bf16[32,16], index: 2, kind: input, shape index: {}]   ;;  %s1326_s3 = inlined_call_operand.vmem [shape: bf16[32,16], index: 3, kind: input, shape index: {}]   ;;  %s1327_s4 = inlined_call_operand.vmem [shape: f32[4,256], index: 4, kind: input, shape index: {}]   ;;  %s1328_s5 = inlined_call_operand.vmem [shape: f32[32,1], index: 5, kind: input, shape index: {}]   ;;  %s1329_s6 = inlined_call_operand.vmem [shape: f32[64,256], index: 6, kind: output, shape index: {}]  }
   0x1 LB: > { %s863_s22 = sadd.s32 4294967295, %s1031_s21   ;;  %p867_p0 = scmp.ge.s32.totalorder %s1031_s21, 1  ;;  %s1031_s21 = sphi %s1081_s21, %s16_s21  }
   0x2   : > { %p214_p1 = scmp.lt.s32.totalorder %s1031_s21, 3 }
   0x4   : > { %p215_p2 = pnand %p867_p0, %p214_p1 }
   0x5   : > { %s868_s23 = sshll.u32 (!%p215_p2), %s863_s22, 1  ;;  %v1033_v0 = vmov (!%p215_p2), 3   ;;  %v1034_v1 = vmov (!%p215_p2), 1   ;;  %v1035_v2 = vmov (!%p215_p2), 0   ;;  %v892_v9 = vld [vmem:[%s1324_s1] sm:$0xff] (!%p215_p2)   ;;  %s1036_s30 = smov (!%p215_p2), 127   ;;  %v282_v21 = vlaneseq (!%p215_p2) }
   0x6   : > { %218 = sbr.rel (%p215_p2) target bundleno = 533 (0x215), region = 44  ;;  %p247_p3 = scmp.lt.s32.totalorder (!%p215_p2), %s868_s23, 3  ;;  %956 = vset.pattern.permute.xlu0 (!%p215_p2), %v1033_v0  ;;  %944 = vset.pattern.permute.xlu1 (!%p215_p2), %v1034_v1  ;;  %v893_v12 = vunpack.c.l.bf16 (!%p215_p2), %v892_v9  ;;  %v894_v13 = vunpack.c.h.bf16 (!%p215_p2), %v892_v9  ;;  %v1038_v15 = vmov (!%p215_p2), 2   ;;  %v1039_v16 = vmov (!%p215_p2), 7  }
   0x7   : > { %667 = vmatprep.mubr.bf16.mxu1 (!%p215_p2), %v1035_v2  ;;  %736 = vmatprep.mubr.bf16.mxu0 (!%p215_p2), %v1035_v2  ;;  %s1037_s7 = smov (!%p215_p2), 1   ;;  %v1040_v17 = vmov (!%p215_p2), 4   ;;  %v1041_v18 = vmov (!%p215_p2), 6   ;;  %s1042_s8 = smov (!%p215_p2), 16   ;;  %v1044_v19 = vmov (!%p215_p2), 5   ;;  %v1045_v20 = vmov (!%p215_p2), 8  }
   0x8   : > { %v945_v14 = vpack.i.bf16 (!%p215_p2), %v894_v13, %v893_v12  ;;  %s1043_s9 = smov (!%p215_p2), 112   ;;  %v291_v22 = vshrl.u32 (!%p215_p2), %v282_v21, 7  ;;  %v1121_v25 = vand.u32 (!%p215_p2), 127, %v282_v21  ;;  %v267_v27 = vld [vmem:[%s1327_s4] ss:$4 sm:$0x3] (!%p215_p2) }
   0x9   : > { %v874_v47 = vld [vmem:[%s1327_s4 + $0x1] ss:$4 sm:$0x3] (!%p215_p2)  ;;  %vm628_vm2 = vcmask (!%p215_p2), 130048   ;;  %s871_s12 = sshll.u32 (!%p215_p2), %s863_s22, 2 }
   0xa   : > { %v1123_v26 = vsub.s32 (!%p215_p2), 0, %v291_v22  ;;  %v1128_v28 = vsub.s32 (!%p215_p2), 1, %v291_v22  ;;  %vm284_vm0 = vcmp.lt.s32.totalorder (!%p215_p2), %v1121_v25, 1  ;;  %vm312_vm1 = vcmp.lt.s32.totalorder (!%p215_p2), %v1121_v25, 127  ;;  %v1021_v12 = vld [vmem:[%s1326_s3] sm:$0xff] (!%p215_p2)   ;;  %p254_p4 = scmp.lt.s32.totalorder (!%p215_p2), %s871_s12, 7 }
   0xb   : > { %vm344_vm3 = vcmp.lt.s32.totalorder (!%p215_p2), %v1121_v25, 16  ;;  %vm502_vm4 = vcmp.lt.s32.totalorder (!%p215_p2), %v1121_v25, 112  ;;  %v1022_v25 = vld [vmem:[%s1325_s2] sm:$0xff] (!%p215_p2)  }
   0xc   : > { %v293_v30 = vrot.slane (!%p215_p2), %v267_v27, %v1123_v26  ;;  %v297_v38 = vrot.slane (!%p215_p2), %v267_v27, %v1128_v28  ;;  %v321_v50 = vrot.slane (!%p215_p2), %v874_v47, %v1123_v26  ;;  %v325_v55 = vrot.slane (!%p215_p2), %v874_v47, %v1128_v28  ;;  %v1023_v27 = vld [vmem:[%s1326_s3 + $0x8] sm:$0xff] (!%p215_p2)  }
   0xd   : > { %s1331_s23 = smov (!%p247_p3, %s868_s23), 3  ;;  %s1333_s12 = smov (!%p254_p4, %s871_s12), 7 }
   0xe   : > { %s889_s24 = sshll.u32 %s1331_s23, 3  ;;  %s890_s13 = sshll.u32 %s1333_s12, 4 }
   0xf   : > { %s251_s27 = scalar_lea.vmem %s1323_s0, %s889_s24  ;;  %s1310_s16 = scalar_lea.vmem %s1329_s6, %s890_s13 }
  0x10   : > { %v1096_v3 = vld [vmem:[%s251_s27] sm:$0xff]  ;;  %v1098_v4 = vld [vmem:[%s251_s27 + $0x8] sm:$0xff] }
  0x11   : > { %v263_v5 = vunpack.c.l.bf16 %v1096_v3  ;;  %v265_v6 = vunpack.c.l.bf16 %v1098_v4  ;;  %v264_v7 = vunpack.c.h.bf16 %v1096_v3  ;;  %v266_v8 = vunpack.c.h.bf16 %v1098_v4 }
  0x12   : > { %v880_v62 = vcombine.high %v1096_v3, %v1098_v4  ;;  %v879_v63 = vcombine.low %v1096_v3, %v1098_v4 }
  0x13   : > { %v934_v10 = vpack.i.bf16 %v265_v6, %v263_v5  ;;  %v939_v11 = vpack.i.bf16 %v266_v8, %v264_v7 }
  0x14   : > { %635 = vmatprep.subr.bf16.mxu1 %v880_v62 }
  0x15   : > { %935 = vrot.lane.b32.xlu1 %v934_v10, %s1036_s30  ;;  %925 = vrot.lane.b32.xlu0 %v934_v10, %s1037_s7 }
  0x16   : > { %636 = vmatpush1.bf16.msra.mxu1 %v879_v63 }
  0x19   : > { %940 = vrot.lane.b32.xlu1 %v939_v11, %s1036_s30  ;;  %930 = vrot.lane.b32.xlu0 %v939_v11, %s1037_s7 }
  0x1a   : > { %881 = vmatmul.mubr.msk.bf16.vlgmr.msra.gmra.mrb[0].mxu1 %vm628_vm2, %v1021_v12 }
  0x1b   : > { %677 = vmatprep.mubr.bf16.mxu1 %v1035_v2 }
  0x1d   : > { %946 = vperm.xlu1 %944, %v945_v14   ;;  %958 = vperm.xlu0 %956, %v945_v14  }
  0x21   : > { %950 = vset.pattern.permute.xlu1 %v1038_v15  ;;  %974 = vset.pattern.permute.xlu0 %v1039_v16 }
  0x22   : > { %952 = vperm.xlu1 %950, %v945_v14   ;;  %976 = vperm.xlu0 %974, %v945_v14  }
  0x23   : > { %882 = vmatmul.mubr.msk.bf16.gmra.mrb[4].mxu1 %vm628_vm2, %v1023_v27 }
  0x26   : > { %962 = vset.pattern.permute.xlu1 %v1040_v17  ;;  %980 = vset.pattern.permute.xlu0 %v1035_v2 }
  0x27   : > { %964 = vperm.xlu1 %962, %v945_v14   ;;  %982 = vperm.xlu0 %980, %v945_v14  }
  0x2b   : > { %968 = vset.pattern.permute.xlu1 %v1041_v18  ;;  %999 = vrot.lane.b32.xlu0 %v934_v10, %s1042_s8 }
  0x2c   : > { %970 = vperm.xlu1 %968, %v945_v14  }
  0x2f   : > { %1009 = vrot.lane.b32.xlu0 %v934_v10, %s1043_s9 }
  0x30   : > { %986 = vset.pattern.permute.xlu1 %v1044_v19 }
  0x31   : > { %988 = vperm.xlu1 %986, %v945_v14  }
  0x35   : > { %992 = vset.pattern.permute.xlu1 %v1045_v20 }
  0x36   : > { %994 = vperm.xlu1 %992, %v945_v14  }
  0x3a   : > { %1004 = vrot.lane.b32.xlu1 %v939_v11, %s1042_s8 }
  0x3b   : > { %1018 = vset.pattern.permute.xlu1 %v1035_v2 }
  0x3e   : > { %1014 = vrot.lane.b32.xlu1 %v939_v11, %s1043_s9 }
  0x87   : > { %v926_v23 = vpop.permute.xlu0 %925  ;;  %v936_v24 = vpop.permute.xlu1 %935 }
  0x88   : > { %v928_v31 = vunpack.i.h.bf16 %v926_v23  ;;  %v927_v32 = vunpack.i.l.bf16 %v926_v23  ;;  %v938_v39 = vunpack.i.h.bf16 %v936_v24  ;;  %v937_v40 = vunpack.i.l.bf16 %v936_v24 }
  0x8b   : > { %v931_v29 = vpop.permute.xlu0 %930  ;;  %v941_v35 = vpop.permute.xlu1 %940 }
  0x8c   : > { %v933_v33 = vunpack.i.h.bf16 %v931_v29  ;;  %v932_v34 = vunpack.i.l.bf16 %v931_v29  ;;  %v943_v43 = vunpack.i.h.bf16 %v941_v35  ;;  %v942_v44 = vunpack.i.l.bf16 %v941_v35 }
  0x8e   : > { %v288_v36 = vsel %vm284_vm0, %v933_v33, %v928_v31  ;;  %v287_v37 = vsel %vm284_vm0, %v932_v34, %v927_v32  ;;  %v286_v45 = vsel %vm284_vm0, %v928_v31, %v933_v33  ;;  %v285_v46 = vsel %vm284_vm0, %v927_v32, %v932_v34  ;;  %v760_v33 = vld [vmem:[%s1328_s5 + $0x18] sm:$0xff] }
  0x8f   : > { %v302_v41 = vmul.f32 %v293_v30, %v288_v36  ;;  %v300_v42 = vmul.f32 %v293_v30, %v287_v37  ;;  %v303_v48 = vmul.f32 %v297_v38, %v286_v45  ;;  %v301_v49 = vmul.f32 %v297_v38, %v285_v46  ;;  %v758_v38 = vld [vmem:[%s1328_s5 + $0x8] sm:$0xff] }
  0x90   : > { %v314_v51 = vsel %vm312_vm1, %v938_v39, %v943_v43  ;;  %v313_v52 = vsel %vm312_vm1, %v937_v40, %v942_v44  ;;  %v316_v56 = vsel %vm312_vm1, %v943_v43, %v938_v39  ;;  %v315_v57 = vsel %vm312_vm1, %v942_v44, %v937_v40  ;;  %v759_v39 = vld [vmem:[%s1328_s5 + $0x10] sm:$0xff] }
  0x91   : > { %338 = vrot.lane.b32.xlu1 %v302_v41, %s1042_s8  ;;  %336 = vrot.lane.b32.xlu0 %v300_v42, %s1042_s8  ;;  %v330_v53 = vmul.f32 %v321_v50, %v314_v51  ;;  %v328_v54 = vmul.f32 %v321_v50, %v313_v52  ;;  %v331_v58 = vmul.f32 %v325_v55, %v316_v56 }
  0x92   : > { %v329_v59 = vmul.f32 %v325_v55, %v315_v57 }
  0x95   : > { %342 = vrot.lane.b32.xlu1 %v303_v48, %s1042_s8  ;;  %340 = vrot.lane.b32.xlu0 %v301_v49, %s1042_s8 }
  0x99   : > { %397 = vrot.lane.b32.xlu1 %v330_v53, %s1042_s8  ;;  %395 = vrot.lane.b32.xlu0 %v328_v54, %s1042_s8 }
  0x9c   : > { %v1153_v60 = vpop.permute.xlu1 %946  ;;  %v959_v1 = vpop.permute.xlu0 %958 }
  0x9d   : > { %401 = vrot.lane.b32.xlu1 %v331_v58, %s1042_s8  ;;  %399 = vrot.lane.b32.xlu0 %v329_v59, %s1042_s8  ;;  %v961_v13 = vunpack.i.h.bf16 %v959_v1  ;;  %v960_v14 = vunpack.i.l.bf16 %v959_v1  ;;  %v948_v62 = vunpack.i.l.bf16 %v1153_v60 }
  0x9f   : > { %v450_v19 = vmul.f32 %v960_v14, %v300_v42  ;;  %v451_v20 = vmul.f32 %v960_v14, %v301_v49  ;;  %v452_v4 = vmul.f32 %v961_v13, %v302_v41 }
  0xa1   : > { %496 = vrot.lane.b32.xlu1 %v302_v41, %s1043_s9  ;;  %494 = vrot.lane.b32.xlu0 %v300_v42, %s1043_s9  ;;  %v1159_v61 = vpop.permute.xlu1 %952  ;;  %v1210_v40 = vpop.permute.xlu0 %976 }
  0xa5   : > { %500 = vrot.lane.b32.xlu1 %v303_v48, %s1043_s9  ;;  %498 = vrot.lane.b32.xlu0 %v301_v49, %s1043_s9 }
  0xa6   : > { %v965_v0 = vpop.permute.xlu1 %964  ;;  %v983_v42 = vpop.permute.xlu0 %982 }
  0xa7   : > { %v967_v9 = vunpack.i.h.bf16 %v965_v0  ;;  %v966_v10 = vunpack.i.l.bf16 %v965_v0  ;;  %v985_v63 = vunpack.i.h.bf16 %v983_v42  ;;  %v984_v0 = vunpack.i.l.bf16 %v983_v42 }
  0xa9   : > { %553 = vrot.lane.b32.xlu1 %v330_v53, %s1043_s9  ;;  %551 = vrot.lane.b32.xlu0 %v328_v54, %s1043_s9  ;;  %v468_v15 = vmul.f32 %v967_v9, %v265_v6  ;;  %v469_v16 = vmul.f32 %v967_v9, %v266_v8  ;;  %v466_v17 = vmul.f32 %v966_v10, %v263_v5  ;;  %v757_v6 = vld [vmem:[%s1328_s5] sm:$0xff] }
  0xaa   : > { %v467_v18 = vmul.f32 %v966_v10, %v264_v7  ;;  %v453_v8 = vmul.f32 %v961_v13, %v303_v48  ;;  %v1000_v44 = vpop.permute.xlu0 %999 }
  0xab   : > { %v1169_v11 = vpop.permute.xlu1 %970  ;;  %v470_v23 = vadd.f32 %v466_v17, %v450_v19  ;;  %v472_v7 = vadd.f32 %v468_v15, %v452_v4  ;;  %v1002_v51 = vunpack.i.h.bf16 %v1000_v44  ;;  %v1001_v52 = vunpack.i.l.bf16 %v1000_v44 }
  0xac   : > { %v471_v3 = vadd.f32 %v467_v18, %v451_v20  ;;  %v473_v24 = vadd.f32 %v469_v16, %v453_v8  ;;  %v875_v18 = vld [vmem:[%s1327_s4 + $0x2] ss:$4 sm:$0x3]  ;;  %v955_v8 = vunpack.i.h.bf16 %v1159_v61 }
  0xad   : > { %557 = vrot.lane.b32.xlu1 %v331_v58, %s1043_s9  ;;  %555 = vrot.lane.b32.xlu0 %v329_v59, %s1043_s9 }
  0xae   : > { %v1216_v46 = vpop.permute.xlu0 %1009 }
  0xb0   : > { %v989_v21 = vpop.permute.xlu1 %988 }
  0xb1   : > { %v991_v22 = vunpack.i.h.bf16 %v989_v21  ;;  %v990_v5 = vunpack.i.l.bf16 %v989_v21  ;;  %763 = vperm.xlu0 %980, %v757_v6   ;;  %768 = vperm.xlu1 %1018, %v758_v38   ;;  %v954_v21 = vunpack.i.l.bf16 %v1159_v61 }
  0xb3   : > { %v482_v29 = vmul.f32 %v990_v5, %v328_v54  ;;  %v483_v30 = vmul.f32 %v990_v5, %v329_v59  ;;  %v484_v31 = vmul.f32 %v991_v22, %v330_v53  ;;  %v485_v32 = vmul.f32 %v991_v22, %v331_v58 }
  0xb4   : > { %v949_v59 = vunpack.i.h.bf16 %v1153_v60  ;;  %v427_v22 = vrot.slane %v875_v18, %v1123_v26  ;;  %v431_v5 = vrot.slane %v875_v18, %v1128_v28 }
  0xb5   : > { %v1195_v34 = vadd.f32 %v482_v29, %v470_v23  ;;  %v1197_v35 = vadd.f32 %v483_v30, %v471_v3  ;;  %v1199_v36 = vadd.f32 %v484_v31, %v472_v7  ;;  %v1201_v37 = vadd.f32 %v485_v32, %v473_v24  ;;  %778 = vperm.xlu0 %980, %v760_v33   ;;  %v1212_v41 = vpop.permute.xlu1 %994 }
  0xb6   : > { %773 = vperm.xlu1 %1018, %v759_v39  }
  0xb9   : > { %v1005_v43 = vpop.permute.xlu1 %1004 }
  0xba   : > { %v1007_v49 = vunpack.i.h.bf16 %v1005_v43  ;;  %v1006_v50 = vunpack.i.l.bf16 %v1005_v43 }
  0xbc   : > { %v376_v1 = vsel %vm344_vm3, %v1002_v51, %v1007_v49  ;;  %v378_v9 = vsel %vm344_vm3, %v1007_v49, %v1002_v51  ;;  %v375_v10 = vsel %vm344_vm3, %v1001_v52, %v1006_v50  ;;  %v377_v12 = vsel %vm344_vm3, %v1006_v50, %v1001_v52 }
  0xbd   : > { %v1214_v45 = vpop.permute.xlu1 %1014  ;;  %v389_v6 = vmul.f32 %v949_v59, %v378_v9  ;;  %v390_v19 = vmul.f32 %v949_v59, %v376_v1  ;;  %v387_v20 = vmul.f32 %v948_v62, %v377_v12  ;;  %v388_v4 = vmul.f32 %v948_v62, %v375_v10 }
  0xbe   : > { %v1016_v1 = vunpack.i.l.bf16 %v1214_v45  ;;  %v1011_v9 = vunpack.i.l.bf16 %v1216_v46 }
 0x103   : > { %v339_v47 = vpop.permute.xlu1 %338  ;;  %v337_v48 = vpop.permute.xlu0 %336 }
 0x107   : > { %v343_v53 = vpop.permute.xlu1 %342  ;;  %v341_v54 = vpop.permute.xlu0 %340 }
 0x108   : > { %v346_v55 = vsel %vm344_vm3, %v339_v47, %v343_v53  ;;  %v348_v56 = vsel %vm344_vm3, %v343_v53, %v339_v47  ;;  %v345_v57 = vsel %vm344_vm3, %v337_v48, %v341_v54  ;;  %v347_v58 = vsel %vm344_vm3, %v341_v54, %v337_v48 }
 0x109   : > { %v361_v13 = vmul.f32 %v985_v63, %v348_v56  ;;  %v362_v14 = vmul.f32 %v985_v63, %v346_v55  ;;  %v359_v15 = vmul.f32 %v984_v0, %v347_v58  ;;  %v360_v16 = vmul.f32 %v984_v0, %v345_v57 }
 0x10a   : > { %v1017_v55 = vunpack.i.h.bf16 %v1214_v45  ;;  %v1012_v56 = vunpack.i.h.bf16 %v1216_v46  ;;  %v876_v45 = vld [vmem:[%s1327_s4 + $0x3] ss:$4 sm:$0x3] }
 0x10b   : > { %v398_v17 = vpop.permute.xlu1 %397  ;;  %v396_v60 = vpop.permute.xlu0 %395  ;;  %v393_v23 = vadd.f32 %v389_v6, %v361_v13  ;;  %v394_v3 = vadd.f32 %v390_v19, %v362_v14  ;;  %v391_v7 = vadd.f32 %v387_v20, %v359_v15  ;;  %v392_v24 = vadd.f32 %v388_v4, %v360_v16 }
 0x10c   : > { %v532_v46 = vsel %vm502_vm4, %v1012_v56, %v1017_v55  ;;  %v534_v13 = vsel %vm502_vm4, %v1017_v55, %v1012_v56  ;;  %v533_v16 = vsel %vm502_vm4, %v1016_v1, %v1011_v9  ;;  %v587_v6 = vrot.slane %v876_v45, %v1128_v28 }
 0x10d   : > { %v583_v19 = vrot.slane %v876_v45, %v1123_v26 }
 0x10f   : > { %v402_v27 = vpop.permute.xlu1 %401  ;;  %v400_v29 = vpop.permute.xlu0 %399 }
 0x110   : > { %v404_v30 = vsel %vm344_vm3, %v398_v17, %v402_v27  ;;  %v406_v31 = vsel %vm344_vm3, %v402_v27, %v398_v17  ;;  %v403_v32 = vsel %vm344_vm3, %v396_v60, %v400_v29  ;;  %v405_v61 = vsel %vm344_vm3, %v400_v29, %v396_v60 }
 0x111   : > { %v417_v33 = vmul.f32 %v955_v8, %v406_v31  ;;  %v418_v38 = vmul.f32 %v955_v8, %v404_v30  ;;  %v415_v39 = vmul.f32 %v954_v21, %v405_v61  ;;  %v416_v42 = vmul.f32 %v954_v21, %v403_v32 }
 0x113   : > { %v421_v43 = vadd.f32 %v417_v33, %v393_v23  ;;  %v422_v44 = vadd.f32 %v418_v38, %v394_v3  ;;  %v419_v47 = vadd.f32 %v415_v39, %v391_v7  ;;  %v420_v48 = vadd.f32 %v416_v42, %v392_v24  ;;  %v497_v49 = vpop.permute.xlu1 %496  ;;  %v495_v50 = vpop.permute.xlu0 %494 }
 0x115   : > { %v436_v51 = vmul.f32 %v427_v22, %v421_v43  ;;  %v434_v52 = vmul.f32 %v427_v22, %v419_v47  ;;  %v435_v53 = vmul.f32 %v431_v5, %v420_v48  ;;  %v437_v54 = vmul.f32 %v431_v5, %v422_v44 }
 0x116   : > { %v997_v22 = vunpack.i.h.bf16 %v1212_v41  ;;  %v996_v5 = vunpack.i.l.bf16 %v1212_v41 }
 0x117   : > { %v501_v57 = vpop.permute.xlu1 %500  ;;  %v499_v58 = vpop.permute.xlu0 %498  ;;  %v491_v59 = vadd.f32 %v1197_v35, %v435_v53  ;;  %v493_v62 = vadd.f32 %v1201_v37, %v437_v54  ;;  %v490_v63 = vadd.f32 %v1195_v34, %v434_v52  ;;  %v492_v0 = vadd.f32 %v1199_v36, %v436_v51 }
 0x118   : > { %v504_v10 = vsel %vm502_vm4, %v497_v49, %v501_v57  ;;  %v506_v12 = vsel %vm502_vm4, %v501_v57, %v497_v49  ;;  %v973_v35 = vunpack.i.h.bf16 %v1169_v11  ;;  %v972_v37 = vunpack.i.l.bf16 %v1169_v11 }
 0x119   : > { %v979_v34 = vunpack.i.h.bf16 %v1210_v40  ;;  %v978_v36 = vunpack.i.l.bf16 %v1210_v40  ;;  %v503_v14 = vsel %vm502_vm4, %v495_v50, %v499_v58  ;;  %v505_v11 = vsel %vm502_vm4, %v499_v58, %v495_v50  ;;  %v1024_v58 = vld [vmem:[%s1325_s2 + $0x8] sm:$0xff]  }
 0x11a   : > { %v531_v40 = vsel %vm502_vm4, %v1011_v9, %v1016_v1  ;;  %v517_v17 = vmul.f32 %v973_v35, %v504_v10  ;;  %v518_v60 = vmul.f32 %v973_v35, %v506_v12  ;;  %v515_v8 = vmul.f32 %v972_v37, %v503_v14 }
 0x11b   : > { %v554_v15 = vpop.permute.xlu1 %553  ;;  %v552_v18 = vpop.permute.xlu0 %551  ;;  %v545_v20 = vmul.f32 %v979_v34, %v532_v46  ;;  %v546_v4 = vmul.f32 %v979_v34, %v534_v13  ;;  %v516_v21 = vmul.f32 %v972_v37, %v505_v11  ;;  %v543_v23 = vmul.f32 %v978_v36, %v531_v40 }
 0x11c   : > { %v544_v3 = vmul.f32 %v978_v36, %v533_v16 }
 0x11d   : > { %v549_v24 = vadd.f32 %v545_v20, %v517_v17  ;;  %v550_v27 = vadd.f32 %v546_v4, %v518_v60  ;;  %v547_v61 = vadd.f32 %v543_v23, %v515_v8 }
 0x11e   : > { %v548_v33 = vadd.f32 %v544_v3, %v516_v21 }
 0x11f   : > { %v558_v7 = vpop.permute.xlu1 %557  ;;  %v556_v26 = vpop.permute.xlu0 %555 }
 0x120   : > { %v560_v29 = vsel %vm502_vm4, %v554_v15, %v558_v7  ;;  %v562_v28 = vsel %vm502_vm4, %v558_v7, %v554_v15  ;;  %v559_v32 = vsel %vm502_vm4, %v552_v18, %v556_v26  ;;  %v561_v41 = vsel %vm502_vm4, %v556_v26, %v552_v18 }
 0x121   : > { %v573_v30 = vmul.f32 %v997_v22, %v560_v29  ;;  %v574_v31 = vmul.f32 %v997_v22, %v562_v28  ;;  %v571_v38 = vmul.f32 %v996_v5, %v559_v32  ;;  %v572_v39 = vmul.f32 %v996_v5, %v561_v41 }
 0x123   : > { %v577_v42 = vadd.f32 %v573_v30, %v549_v24  ;;  %v578_v43 = vadd.f32 %v574_v31, %v550_v27  ;;  %v575_v44 = vadd.f32 %v571_v38, %v547_v61  ;;  %v576_v47 = vadd.f32 %v572_v39, %v548_v33 }
 0x125   : > { %v593_v48 = vmul.f32 %v587_v6, %v578_v43  ;;  %v592_v49 = vmul.f32 %v583_v19, %v577_v42  ;;  %v591_v50 = vmul.f32 %v587_v6, %v576_v47  ;;  %v590_v51 = vmul.f32 %v583_v19, %v575_v44 }
 0x127   : > { %v597_v52 = vadd.f32 %v593_v48, %v493_v62  ;;  %v596_v53 = vadd.f32 %v592_v49, %v492_v0  ;;  %v595_v54 = vadd.f32 %v591_v50, %v491_v59  ;;  %v594_v55 = vadd.f32 %v590_v51, %v490_v63  ;;  %v669_v59 = vpop.f32.mrb[0].mxu1 }
 0x128   : > { %v671_v62 = vpop.f32.mrb[1].mxu1 }
 0x129   : > { %v603_v56 = vpack.c.bf16 %v597_v52, %v595_v54  ;;  %v602_v57 = vpack.c.bf16 %v596_v53, %v594_v55  ;;  %v673_v63 = vpop.f32.mrb[2].mxu1 }
 0x12a   : > { %v675_v0 = vpop.f32.mrb[3].mxu1 }
 0x12b   : > { %704 = vmatprep.subr.bf16.mxu0 %v603_v56  ;;  %v679_v1 = vpop.f32.mrb[4].mxu1 }
 0x12c   : > { %705 = vmatpush1.bf16.msra.mxu0 %v602_v57  ;;  %v681_v9 = vpop.f32.mrb[5].mxu1 }
 0x12d   : > { %v683_v10 = vpop.f32.mrb[6].mxu1 }
 0x12e   : > { %v685_v12 = vpop.f32.mrb[7].mxu1 }
 0x12f   : > { %885 = vmatmul.mubr.msk.bf16.vlgmr.msra.gmra.mrb[0].mxu0 %vm628_vm2, %v1022_v25 }
 0x130   : > { %746 = vmatprep.mubr.bf16.mxu0 %v1035_v2  ;;  %v764_v2 = vpop.permute.xlu0 %763  ;;  %v769_v46 = vpop.permute.xlu1 %768 }
 0x134   : > { %v779_v24 = vpop.permute.xlu0 %778 }
 0x135   : > { %v774_v21 = vpop.permute.xlu1 %773 }
 0x137   : > { %886 = vmatmul.mubr.msk.bf16.gmra.mrb[4].mxu0 %vm628_vm2, %v1024_v58 }
 0x202   : > { %v738_v35 = vpop.f32.mrb[0].mxu0 }
 0x203   : > { %v739_v37 = vadd.f32 %v738_v35, %v669_v59  ;;  %v740_v34 = vpop.f32.mrb[1].mxu0 }
 0x204   : > { %v741_v36 = vadd.f32 %v740_v34, %v671_v62  ;;  %v742_v45 = vpop.f32.mrb[2].mxu0 }
 0x205   : > { %v781_v13 = vadd.f32 %v764_v2, %v739_v37  ;;  %v743_v14 = vadd.f32 %v742_v45, %v673_v63  ;;  %v744_v11 = vpop.f32.mrb[3].mxu0 }
 0x206   : > { %v782_v15 = vadd.f32 %v764_v2, %v741_v36  ;;  %v745_v40 = vadd.f32 %v744_v11, %v675_v0 }
 0x207   : > { %v789_v16 = vmax.f32 %v781_v13, 0.0  ;;  %v783_v17 = vadd.f32 %v769_v46, %v743_v14 }
 0x208   : > { %v790_v60 = vmax.f32 %v782_v15, 0.0  ;;  %v784_v18 = vadd.f32 %v769_v46, %v745_v40 }
 0x209   : > { %797 = vst [vmem:[%s1310_s16] sm:$0xff] %v789_v16  ;;  %v791_v6 = vmax.f32 %v783_v17, 0.0 }
 0x20a   : > { %798 = vst [vmem:[%s1310_s16 + $0x8] sm:$0xff] %v790_v60  ;;  %v792_v19 = vmax.f32 %v784_v18, 0.0  ;;  %v748_v20 = vpop.f32.mrb[4].mxu0 }
 0x20b   : > { %799 = vst [vmem:[%s1310_s16 + $0x10] sm:$0xff] %v791_v6  ;;  %v749_v4 = vadd.f32 %v748_v20, %v679_v1  ;;  %v750_v8 = vpop.f32.mrb[5].mxu0 }
 0x20c   : > { %800 = vst [vmem:[%s1310_s16 + $0x18] sm:$0xff] %v792_v19  ;;  %v751_v22 = vadd.f32 %v750_v8, %v681_v9  ;;  %v752_v5 = vpop.f32.mrb[6].mxu0 }
 0x20d   : > { %v785_v23 = vadd.f32 %v774_v21, %v749_v4  ;;  %v753_v3 = vadd.f32 %v752_v5, %v683_v10  ;;  %v754_v7 = vpop.f32.mrb[7].mxu0 }
 0x20e   : > { %v786_v27 = vadd.f32 %v774_v21, %v751_v22  ;;  %v755_v29 = vadd.f32 %v754_v7, %v685_v12 }
 0x20f   : > { %v793_v28 = vmax.f32 %v785_v23, 0.0  ;;  %v787_v26 = vadd.f32 %v779_v24, %v753_v3 }
 0x210   : > { %v794_v30 = vmax.f32 %v786_v27, 0.0  ;;  %v788_v31 = vadd.f32 %v779_v24, %v755_v29 }
 0x211   : > { %801 = vst [vmem:[%s1310_s16 + $0x20] sm:$0xff] %v793_v28  ;;  %v795_v32 = vmax.f32 %v787_v26, 0.0 }
 0x212   : > { %802 = vst [vmem:[%s1310_s16 + $0x28] sm:$0xff] %v794_v30  ;;  %v796_v41 = vmax.f32 %v788_v31, 0.0 }
 0x213   : > { %803 = vst [vmem:[%s1310_s16 + $0x30] sm:$0xff] %v795_v32 }
 0x214   : > { %804 = vst [vmem:[%s1310_s16 + $0x38] sm:$0xff] %v796_v41 }
 0x215 PF: > { %s16_s21 = sadd.s32 1, %s1031_s21  }
 0x216   : > { %p13_p5 = scmp.ge.s32.totalorder %s16_s21, 4  }
 0x218   :  { %15 = sbr.rel (!%p13_p5) target bundleno = 1 (0x1), region = 77 }

</bundles_post_ra>
